<compile_context>
chip_gen: v6e
topology: v6e:2x2x1
jax: 0.10.0
libtpu: 0.0.40
codegen_flags: <defaults>
</compile_context>

<pallas_src>
import functools

import jax
import jax.numpy as jnp
from jax.experimental import pallas as pl
from jax.experimental.pallas import tpu as pltpu  # noqa: F401  (used when scaling up)

BN_EPS = 1e-5


def residual_net_kernel(
    x_ref,            # [B, F_in]        f32
    w1_ref,           # [F_in, H]        bf16   (fc1 weight; bias dropped, pre-BN)
    bn1_ref,          # [2, H]           f32    rows: (gamma, beta)
    wb1_ref,          # [L, H, H]        bf16   (block fc1; bias dropped, pre-BN)
    wb2_ref,          # [L, H, H]        bf16   (block fc2)
    pb_ref,           # [L, 3, H]        f32    rows: (gamma, beta, fc2 bias)
    w2_ref,           # [H, Opad]        bf16   (final fc2, zero-padded to 128 lanes)
    b2_ref,           # [1, Opad]        f32
    out_ref,          # [B, Opad]        f32
):
    f32 = jnp.float32
    bf16 = jnp.bfloat16

    def bn_relu(h, gamma, beta):
        # Training-mode BatchNorm1d (biased variance) fused to scale/shift, then ReLU.
        mean = jnp.mean(h, axis=0, keepdims=True)
        msq = jnp.mean(h * h, axis=0, keepdims=True)
        inv = jax.lax.rsqrt(msq - mean * mean + BN_EPS)
        scale = gamma * inv
        shift = beta - mean * scale
        return jnp.maximum(h * scale + shift, 0.0)

    # fc1 -> bn1 -> relu   (dropout p=0 is identity; fc1 bias cancelled by BN)
    h = jnp.dot(x_ref[...].astype(bf16), w1_ref[...], preferred_element_type=f32)
    h = bn_relu(h, bn1_ref[0:1, :], bn1_ref[1:2, :])

    num_blocks = wb1_ref.shape[0]

    def block(l, h):
        residual = h
        p = pb_ref[l]                                   # [3, H] f32: gamma, beta, bias2
        t = jnp.dot(h.astype(bf16), wb1_ref[l], preferred_element_type=f32)
        t = bn_relu(t, p[0:1, :], p[1:2, :])            # dropout p=0 -> identity
        u = jnp.dot(t.astype(bf16), wb2_ref[l], preferred_element_type=f32) + p[2:3, :]
        return jnp.maximum(u + residual, 0.0)

    if num_blocks <= 4:
        # Small L: static unroll (LLO sees the whole straight-line schedule).
        for l in range(num_blocks):
            h = block(l, h)
    else:
        # Large L: bound live ranges / code size with a real loop.
        h = jax.lax.fori_loop(0, num_blocks, block, h)

    # final fc2 (lane-dense padded output; wrapper slices back to O columns)
    out_ref[...] = (
        jnp.dot(h.astype(bf16), w2_ref[...], preferred_element_type=f32) + b2_ref[...]
    ).astype(out_ref.dtype)


def pack_params(params):
    """One-time layout plumbing: bf16 weights, packed per-feature vectors, padding.

    NOTE: b1 / bb1 (Linear biases feeding straight into training-mode BN) are
    intentionally dropped: BN mean-subtraction cancels them exactly.
    """
    O = params["w2"].shape[1]
    Opad = ((O + 127) // 128) * 128      # lane-dense output
    wdt = jnp.bfloat16
    packed = dict(
        w1=params["w1"].astype(wdt),
        bn1=jnp.concatenate([params["g1"], params["be1"]], axis=0),                # [2, H]
        wb1=params["wb1"].astype(wdt),
        wb2=params["wb2"].astype(wdt),
        pb=jnp.concatenate([params["gb"], params["beb"], params["bb2"]], axis=1),  # [L, 3, H]
        w2=jnp.pad(params["w2"], ((0, 0), (0, Opad - O))).astype(wdt),
        b2=jnp.pad(params["b2"], ((0, 0), (0, Opad - O))),
    )
    return packed, O


@functools.partial(jax.jit, static_argnames=("out_features",))
def residual_net_forward(x, packed, out_features):
    B = x.shape[0]
    F_in, H = packed["w1"].shape
    Opad = packed["w2"].shape[1]
    L = packed["wb1"].shape[0]

    flops = 2 * B * (F_in * H + 2 * L * H * H + H * Opad)
    bytes_accessed = (
        x.size * 4
        + (packed["w1"].size + packed["wb1"].size + packed["wb2"].size + packed["w2"].size) * 2
        + (packed["bn1"].size + packed["pb"].size + packed["b2"].size) * 4
        + B * Opad * 4
    )

    out = pl.pallas_call(
        residual_net_kernel,
        out_shape=jax.ShapeDtypeStruct((B, Opad), jnp.float32),
        cost_estimate=pl.CostEstimate(
            flops=flops,
            transcendentals=(1 + L) * H,      # one rsqrt lane per BN feature
            bytes_accessed=bytes_accessed,
        ),
    )(x, packed["w1"], packed["bn1"], packed["wb1"], packed["wb2"],
      packed["pb"], packed["w2"], packed["b2"])
    return out[:, :out_features]


# ----------------------------- init & reference -----------------------------

def _xavier_uniform(key, fan_in, fan_out):
    limit = jnp.sqrt(6.0 / (fan_in + fan_out))
    return jax.random.uniform(key, (fan_in, fan_out), jnp.float32, -limit, limit)


def _bias_uniform(key, fan_in, fan_out):
    bound = 1.0 / jnp.sqrt(fan_in)
    return jax.random.uniform(key, (1, fan_out), jnp.float32, -bound, bound)


def init_params(key, input_size, hidden_size, output_size, num_hidden_layers):
    keys = jax.random.split(key, 8)
    params = {
        # net fc1 + bn1 (biases kept in the "PyTorch" param set; pack_params
        # drops the pre-BN ones by construction)
        "w1": _xavier_uniform(keys[0], input_size, hidden_size),
        "b1": _bias_uniform(keys[1], input_size, hidden_size),
        "g1": jnp.ones((1, hidden_size), jnp.float32),
        "be1": jnp.zeros((1, hidden_size), jnp.float32),
        # net fc2
        "w2": _xavier_uniform(keys[2], hidden_size, output_size),
        "b2": _bias_uniform(keys[3], hidden_size, output_size),
    }
    wb1, bb1, gb, beb, wb2, bb2 = [], [], [], [], [], []
    for l in range(num_hidden_layers):
        bkeys = jax.random.split(jax.random.fold_in(keys[4], l), 4)
        wb1.append(_xavier_uniform(bkeys[0], hidden_size, hidden_size))
        bb1.append(_bias_uniform(bkeys[1], hidden_size, hidden_size))
        gb.append(jnp.ones((1, hidden_size), jnp.float32))
        beb.append(jnp.zeros((1, hidden_size), jnp.float32))
        wb2.append(_xavier_uniform(bkeys[2], hidden_size, hidden_size))
        bb2.append(_bias_uniform(bkeys[3], hidden_size, hidden_size))
    params.update(
        wb1=jnp.stack(wb1), bb1=jnp.stack(bb1),
        gb=jnp.stack(gb), beb=jnp.stack(beb),
        wb2=jnp.stack(wb2), bb2=jnp.stack(bb2),
    )
    return params


def reference_forward(x, p, quantize_weights):
    """Pure-JAX mirror of the PyTorch module (biases included, centered BN var).

    quantize_weights=True mirrors the kernel's bf16 weight/activation casts at
    the matmul inputs (f32 accumulation) for a tight apples-to-apples check.
    """
    def mm(a, w):
        if quantize_weights:
            return jnp.dot(a.astype(jnp.bfloat16), w.astype(jnp.bfloat16),
                           preferred_element_type=jnp.float32)
        return jnp.dot(a, w, preferred_element_type=jnp.float32)

    def bn(h, g, b):
        m = jnp.mean(h, axis=0, keepdims=True)
        v = jnp.mean(jnp.square(h - m), axis=0, keepdims=True)
        return (h - m) * jax.lax.rsqrt(v + BN_EPS) * g + b

    h = jnp.maximum(bn(mm(x, p["w1"]) + p["b1"], p["g1"], p["be1"]), 0.0)
    for l in range(p["wb1"].shape[0]):
        r = h
        t = jnp.maximum(bn(mm(h, p["wb1"][l]) + p["bb1"][l], p["gb"][l], p["beb"][l]), 0.0)
        h = jnp.maximum(mm(t, p["wb2"][l]) + p["bb2"][l] + r, 0.0)
    return mm(h, p["w2"]) + p["b2"]


if __name__ == "__main__":
    # NOTE: at B=8 the MXU is ~3-6% row-utilized; batch independent forwards
    # toward M=128/256 at the call site before tuning anything in-kernel.
    B, INPUT, HIDDEN, OUTPUT, L = 8, 64, 128, 64, 1

    key = jax.random.PRNGKey(0)
    kx, kp = jax.random.split(key)
    x = jax.random.normal(kx, (B, INPUT), jnp.float32)
    params = init_params(kp, INPUT, HIDDEN, OUTPUT, L)

    packed, out_features = pack_params(params)   # one-time layout plumbing
    out = jax.block_until_ready(residual_net_forward(x, packed, out_features))
    assert out.shape == (B, OUTPUT)

    # Tight check vs. a reference that mirrors the kernel's bf16 matmul casts
    # (validates structure + the pre-BN-bias cancellation + fused BN).
    ref_q = reference_forward(x, params, quantize_weights=True)
    assert jnp.allclose(out, ref_q, atol=5e-3, rtol=5e-3), "mismatch vs bf16-weight reference"

    # Fidelity check vs. the pure-f32 PyTorch-equivalent forward (tolerance
    # covers bf16 weight quantization only).
    ref_f = reference_forward(x, params, quantize_weights=False)
    assert jnp.allclose(out, ref_f, atol=5e-2, rtol=5e-2), "mismatch vs f32 reference"

    print("KERNEL_OK")
</pallas_src>

<mosaic_0001>
module attributes {stable_mosaic.version = 11 : i64} {
  func.func @residual_net_kernel(%arg0: memref<8x64xf32, #tpu.memory_space<vmem>>, %arg1: memref<64x128xbf16, #tpu.memory_space<vmem>>, %arg2: memref<2x128xf32, #tpu.memory_space<vmem>>, %arg3: memref<1x128x128xbf16, #tpu.memory_space<vmem>>, %arg4: memref<1x128x128xbf16, #tpu.memory_space<vmem>>, %arg5: memref<1x3x128xf32, #tpu.memory_space<vmem>>, %arg6: memref<128x128xbf16, #tpu.memory_space<vmem>>, %arg7: memref<1x128xf32, #tpu.memory_space<vmem>>, %arg8: memref<8x128xf32, #tpu.memory_space<vmem>>) attributes {dimension_semantics = [], scalar_prefetch = 0 : i64, scratch_operands = 0 : i64, tpu.core_type = #tpu.core_type<tc>} {
    %c0 = arith.constant 0 : index
    %c0_0 = arith.constant 0 : index
    %0 = vector.load %arg0[%c0, %c0_0] : memref<8x64xf32, #tpu.memory_space<vmem>>, vector<8x64xf32>
    %1 = arith.truncf %0 : vector<8x64xf32> to vector<8x64xbf16>
    %c0_1 = arith.constant 0 : index
    %c0_2 = arith.constant 0 : index
    %2 = vector.load %arg1[%c0_1, %c0_2] : memref<64x128xbf16, #tpu.memory_space<vmem>>, vector<64x128xbf16>
    %cst = arith.constant dense<0.000000e+00> : vector<8x128xf32>
    %3 = tpu.matmul %1, %2, %cst {dimension_numbers = #tpu.dot_dimension_numbers<[1], [0], [0], [1], [0, 0, 1, 1], [], []>} : vector<8x64xbf16>, vector<64x128xbf16>, vector<8x128xf32> -> vector<8x128xf32>
    %c0_3 = arith.constant 0 : index
    %c0_4 = arith.constant 0 : index
    %4 = vector.load %arg2[%c0_3, %c0_4] : memref<2x128xf32, #tpu.memory_space<vmem>>, vector<1x128xf32>
    %c1 = arith.constant 1 : index
    %c0_5 = arith.constant 0 : index
    %5 = vector.load %arg2[%c1, %c0_5] : memref<2x128xf32, #tpu.memory_space<vmem>>, vector<1x128xf32>
    %cst_6 = arith.constant dense<0.000000e+00> : vector<128xf32>
    %6 = vector.multi_reduction <add>, %3, %cst_6 [0] : vector<8x128xf32> to vector<128xf32>
    %7 = vector.shape_cast %6 : vector<128xf32> to vector<1x128xf32>
    %cst_7 = arith.constant 8.000000e+00 : f32
    %8 = vector.broadcast %cst_7 : f32 to vector<1x128xf32>
    %9 = arith.divf %7, %8 : vector<1x128xf32>
    %10 = arith.mulf %3, %3 : vector<8x128xf32>
    %cst_8 = arith.constant dense<0.000000e+00> : vector<128xf32>
    %11 = vector.multi_reduction <add>, %10, %cst_8 [0] : vector<8x128xf32> to vector<128xf32>
    %12 = vector.shape_cast %11 : vector<128xf32> to vector<1x128xf32>
    %cst_9 = arith.constant 8.000000e+00 : f32
    %13 = vector.broadcast %cst_9 : f32 to vector<1x128xf32>
    %14 = arith.divf %12, %13 : vector<1x128xf32>
    %15 = arith.mulf %9, %9 : vector<1x128xf32>
    %16 = arith.subf %14, %15 : vector<1x128xf32>
    %cst_10 = arith.constant 9.99999974E-6 : f32
    %17 = vector.broadcast %cst_10 : f32 to vector<1x128xf32>
    %18 = arith.addf %16, %17 : vector<1x128xf32>
    %19 = math.rsqrt %18 : vector<1x128xf32>
    %20 = arith.mulf %4, %19 : vector<1x128xf32>
    %21 = arith.mulf %9, %20 : vector<1x128xf32>
    %22 = arith.subf %5, %21 : vector<1x128xf32>
    %23 = vector.broadcast %20 : vector<1x128xf32> to vector<8x128xf32>
    %24 = arith.mulf %3, %23 : vector<8x128xf32>
    %25 = vector.broadcast %22 : vector<1x128xf32> to vector<8x128xf32>
    %26 = arith.addf %24, %25 : vector<8x128xf32>
    %cst_11 = arith.constant 0.000000e+00 : f32
    %27 = vector.broadcast %cst_11 : f32 to vector<8x128xf32>
    %28 = arith.maximumf %26, %27 : vector<8x128xf32>
    %c0_12 = arith.constant 0 : index
    %c0_13 = arith.constant 0 : index
    %c0_14 = arith.constant 0 : index
    %29 = vector.load %arg5[%c0_12, %c0_13, %c0_14] : memref<1x3x128xf32, #tpu.memory_space<vmem>>, vector<1x3x128xf32>
    %30 = vector.shape_cast %29 : vector<1x3x128xf32> to vector<3x128xf32>
    %31 = arith.truncf %28 : vector<8x128xf32> to vector<8x128xbf16>
    %c0_15 = arith.constant 0 : index
    %c0_16 = arith.constant 0 : index
    %c0_17 = arith.constant 0 : index
    %32 = vector.load %arg3[%c0_15, %c0_16, %c0_17] : memref<1x128x128xbf16, #tpu.memory_space<vmem>>, vector<1x128x128xbf16>
    %33 = vector.shape_cast %32 : vector<1x128x128xbf16> to vector<128x128xbf16>
    %cst_18 = arith.constant dense<0.000000e+00> : vector<8x128xf32>
    %34 = tpu.matmul %31, %33, %cst_18 {dimension_numbers = #tpu.dot_dimension_numbers<[1], [0], [0], [1], [0, 0, 1, 1], [], []>} : vector<8x128xbf16>, vector<128x128xbf16>, vector<8x128xf32> -> vector<8x128xf32>
    %35 = vector.extract_strided_slice %30 {offsets = [0, 0], sizes = [1, 128], strides = [1, 1]} : vector<3x128xf32> to vector<1x128xf32>
    %36 = vector.extract_strided_slice %30 {offsets = [1, 0], sizes = [1, 128], strides = [1, 1]} : vector<3x128xf32> to vector<1x128xf32>
    %cst_19 = arith.constant dense<0.000000e+00> : vector<128xf32>
    %37 = vector.multi_reduction <add>, %34, %cst_19 [0] : vector<8x128xf32> to vector<128xf32>
    %38 = vector.shape_cast %37 : vector<128xf32> to vector<1x128xf32>
    %cst_20 = arith.constant 8.000000e+00 : f32
    %39 = vector.broadcast %cst_20 : f32 to vector<1x128xf32>
    %40 = arith.divf %38, %39 : vector<1x128xf32>
    %41 = arith.mulf %34, %34 : vector<8x128xf32>
    %cst_21 = arith.constant dense<0.000000e+00> : vector<128xf32>
    %42 = vector.multi_reduction <add>, %41, %cst_21 [0] : vector<8x128xf32> to vector<128xf32>
    %43 = vector.shape_cast %42 : vector<128xf32> to vector<1x128xf32>
    %cst_22 = arith.constant 8.000000e+00 : f32
    %44 = vector.broadcast %cst_22 : f32 to vector<1x128xf32>
    %45 = arith.divf %43, %44 : vector<1x128xf32>
    %46 = arith.mulf %40, %40 : vector<1x128xf32>
    %47 = arith.subf %45, %46 : vector<1x128xf32>
    %cst_23 = arith.constant 9.99999974E-6 : f32
    %48 = vector.broadcast %cst_23 : f32 to vector<1x128xf32>
    %49 = arith.addf %47, %48 : vector<1x128xf32>
    %50 = math.rsqrt %49 : vector<1x128xf32>
    %51 = arith.mulf %35, %50 : vector<1x128xf32>
    %52 = arith.mulf %40, %51 : vector<1x128xf32>
    %53 = arith.subf %36, %52 : vector<1x128xf32>
    %54 = vector.broadcast %51 : vector<1x128xf32> to vector<8x128xf32>
    %55 = arith.mulf %34, %54 : vector<8x128xf32>
    %56 = vector.broadcast %53 : vector<1x128xf32> to vector<8x128xf32>
    %57 = arith.addf %55, %56 : vector<8x128xf32>
    %cst_24 = arith.constant 0.000000e+00 : f32
    %58 = vector.broadcast %cst_24 : f32 to vector<8x128xf32>
    %59 = arith.maximumf %57, %58 : vector<8x128xf32>
    %60 = arith.truncf %59 : vector<8x128xf32> to vector<8x128xbf16>
    %c0_25 = arith.constant 0 : index
    %c0_26 = arith.constant 0 : index
    %c0_27 = arith.constant 0 : index
    %61 = vector.load %arg4[%c0_25, %c0_26, %c0_27] : memref<1x128x128xbf16, #tpu.memory_space<vmem>>, vector<1x128x128xbf16>
    %62 = vector.shape_cast %61 : vector<1x128x128xbf16> to vector<128x128xbf16>
    %cst_28 = arith.constant dense<0.000000e+00> : vector<8x128xf32>
    %63 = tpu.matmul %60, %62, %cst_28 {dimension_numbers = #tpu.dot_dimension_numbers<[1], [0], [0], [1], [0, 0, 1, 1], [], []>} : vector<8x128xbf16>, vector<128x128xbf16>, vector<8x128xf32> -> vector<8x128xf32>
    %64 = vector.extract_strided_slice %30 {offsets = [2, 0], sizes = [1, 128], strides = [1, 1]} : vector<3x128xf32> to vector<1x128xf32>
    %65 = vector.broadcast %64 : vector<1x128xf32> to vector<8x128xf32>
    %66 = arith.addf %63, %65 : vector<8x128xf32>
    %67 = arith.addf %66, %28 : vector<8x128xf32>
    %cst_29 = arith.constant 0.000000e+00 : f32
    %68 = vector.broadcast %cst_29 : f32 to vector<8x128xf32>
    %69 = arith.maximumf %67, %68 : vector<8x128xf32>
    %70 = arith.truncf %69 : vector<8x128xf32> to vector<8x128xbf16>
    %c0_30 = arith.constant 0 : index
    %c0_31 = arith.constant 0 : index
    %71 = vector.load %arg6[%c0_30, %c0_31] : memref<128x128xbf16, #tpu.memory_space<vmem>>, vector<128x128xbf16>
    %cst_32 = arith.constant dense<0.000000e+00> : vector<8x128xf32>
    %72 = tpu.matmul %70, %71, %cst_32 {dimension_numbers = #tpu.dot_dimension_numbers<[1], [0], [0], [1], [0, 0, 1, 1], [], []>} : vector<8x128xbf16>, vector<128x128xbf16>, vector<8x128xf32> -> vector<8x128xf32>
    %c0_33 = arith.constant 0 : index
    %c0_34 = arith.constant 0 : index
    %73 = vector.load %arg7[%c0_33, %c0_34] : memref<1x128xf32, #tpu.memory_space<vmem>>, vector<1x128xf32>
    %74 = vector.broadcast %73 : vector<1x128xf32> to vector<8x128xf32>
    %75 = arith.addf %72, %74 : vector<8x128xf32>
    %c0_35 = arith.constant 0 : index
    %c0_36 = arith.constant 0 : index
    %76 = vector.load %arg8[%c0_35, %c0_36] : memref<8x128xf32, #tpu.memory_space<vmem>>, vector<8x128xf32>
    tpu.vector_store %arg8[%c0_35, %c0_36], %75 {strides = array<i32>} : memref<8x128xf32, #tpu.memory_space<vmem>>, vector<8x128xf32>,
    return
  }
}

</mosaic_0001>

<bundles_post_ra>
// kernel: residual_net_forward.1
= control target key start
LH: loop header
LB: loop body
LE: loop exit
PB: predicated region body
PF: predicated region fallthrough
CT: control target
= control target key end

     0   :  { %13 = vsyncpa [#allocation3], 0  ;;  %s1046_s0 = inlined_call_operand.hbm [shape: f32[8,64], index: 0, kind: input, shape index: {}]   ;;  %s1047_s1 = inlined_call_operand.hbm [shape: bf16[64,128], index: 1, kind: input, shape index: {}]   ;;  %s1048_s2 = inlined_call_operand.vmem [shape: f32[2,128], index: 2, kind: input, shape index: {}]   ;;  %s1049_s3 = inlined_call_operand.hbm [shape: bf16[1,128,128], index: 3, kind: input, shape index: {}]   ;;  %s1050_s4 = inlined_call_operand.hbm [shape: bf16[1,128,128], index: 4, kind: input, shape index: {}]   ;;  %s1051_s5 = inlined_call_operand.vmem [shape: f32[1,3,128], index: 5, kind: input, shape index: {}]   ;;  %s1052_s6 = inlined_call_operand.hbm [shape: bf16[128,128], index: 6, kind: input, shape index: {}]   ;;  %s1053_s7 = inlined_call_operand.vmem [shape: f32[1,128], index: 7, kind: input, shape index: {}]   ;;  %s1054_s8 = inlined_call_operand.hbm [shape: f32[8,128], index: 8, kind: output, shape index: {}]  }
   0x1   :  { %14 = vsyncpa [#allocation6], 0 }
   0x2   :  { %15 = vsyncpa [#allocation9], 0 }
   0x3   :  { %16 = vsyncpa [#allocation4], 0  ;;  %s898_s27 = smov [#allocation5]  }
   0x4   :  { %s32_s28 = sshll.u32 %s898_s27, 4  ;;  %s33_s28 = int_to_ptr.vmem [resolvable:$true] %s32_s28 }
   0x5   :  { %s778_s29 = scalar_lea.vmem %s33_s28, 512  ;;  %p783_p1 = scmp.lt.s32.totalorder %s33_s28, %s33_s28 }
   0x6   :  { %p779_p0 = scmp.ne.s32.totalorder %s33_s28, %s778_s29  ;;  %p784_p2 = scmp.lt.s32.totalorder %s778_s29, %s778_s29 }
   0x8   :  { %p785_p3 = por %p784_p2, %p783_p1 }
   0xa   :  { %p786_p4 = pnand %p785_p3, %p779_p0 }
   0xc   :  { %789 = shalt.err (!%p786_p4)
}
   0xd   :  { %s899_s30 = smov 64   ;;  %s900_s9 = smov 4  }
   0xe   :  { %38 = dma.hbm_to_vmem [thread:$0]  %s1047_s1, 512, %s33_s28, [#allocation6], %s899_s30, %s899_s30, %s900_s9  }
   0xf   :  { %s901_s12 = smov [#allocation8]   ;;  %s902_s14 = smov [#allocation2]  }
  0x10   :  { %s58_s13 = sshll.u32 %s901_s12, 4  ;;  %s23_s15 = sshll.u32 %s902_s14, 4  ;;  %s59_s13 = int_to_ptr.vmem [resolvable:$true] %s58_s13  ;;  %s24_s15 = int_to_ptr.vmem [resolvable:$true] %s23_s15 }
  0x11   :  { %s798_s16 = scalar_lea.vmem %s59_s13, 1024  ;;  %p803_p6 = scmp.lt.s32.totalorder %s59_s13, %s59_s13 }
  0x12   :  { %p799_p5 = scmp.ne.s32.totalorder %s59_s13, %s798_s16  ;;  %p804_p7 = scmp.lt.s32.totalorder %s798_s16, %s798_s16 }
  0x14   :  { %p805_p8 = por %p804_p7, %p803_p6 }
  0x16   :  { %p806_p9 = pnand %p805_p8, %p799_p5 }
  0x18   :  { %809 = shalt.err (!%p806_p9)
}
  0x19   :  { %64 = dma.hbm_to_vmem [thread:$0]  %s1050_s4, 1024, %s59_s13, [#allocation9], %s899_s30, %s899_s30, %s900_s9  }
  0x1a   :  { %s818_s1 = scalar_lea.vmem %s24_s15, 128  ;;  %p823_p11 = scmp.lt.s32.totalorder %s24_s15, %s24_s15 }
  0x1b   :  { %p819_p10 = scmp.ne.s32.totalorder %s24_s15, %s818_s1  ;;  %p824_p12 = scmp.lt.s32.totalorder %s818_s1, %s818_s1 }
  0x1d   :  { %p825_p13 = por %p824_p12, %p823_p11 }
  0x1f   :  { %p826_p0 = pnand %p825_p13, %p819_p10 }
  0x21   :  { %829 = shalt.err (!%p826_p0)
}
  0x22   :  { %26 = dma.hbm_to_vmem [thread:$0]  %s1046_s0, 128, %s24_s15, [#allocation3]  }
  0x23   :  { %s903_s21 = smov [#allocation7]   ;;  %s904_s23 = smov [#allocation10]  }
  0x24   :  { %s46_s22 = sshll.u32 %s903_s21, 4  ;;  %s72_s24 = sshll.u32 %s904_s23, 4  ;;  %s47_s22 = int_to_ptr.vmem [resolvable:$true] %s46_s22  ;;  %s73_s24 = int_to_ptr.vmem [resolvable:$true] %s72_s24 }
  0x25   :  { %s838_s25 = scalar_lea.vmem %s47_s22, 1024  ;;  %p843_p2 = scmp.lt.s32.totalorder %s47_s22, %s47_s22 }
  0x26   :  { %p839_p1 = scmp.ne.s32.totalorder %s47_s22, %s838_s25  ;;  %p844_p3 = scmp.lt.s32.totalorder %s838_s25, %s838_s25 }
  0x28   :  { %p845_p4 = por %p844_p3, %p843_p2 }
  0x2a   :  { %p846_p5 = pnand %p845_p4, %p839_p1 }
  0x2c   :  { %849 = shalt.err (!%p846_p5)
}
  0x2d   :  { %52 = dma.hbm_to_vmem [thread:$0]  %s1049_s3, 1024, %s47_s22, [#allocation6], %s899_s30, %s899_s30, %s900_s9  }
  0x2e   :  { %s858_s0 = scalar_lea.vmem %s73_s24, 1024  ;;  %p863_p7 = scmp.lt.s32.totalorder %s73_s24, %s73_s24 }
  0x2f   :  { %p859_p6 = scmp.ne.s32.totalorder %s73_s24, %s858_s0  ;;  %p864_p8 = scmp.lt.s32.totalorder %s858_s0, %s858_s0 }
  0x31   :  { %p865_p9 = por %p864_p8, %p863_p7 }
  0x33   :  { %p866_p10 = pnand %p865_p9, %p859_p6 }
  0x35   :  { %869 = shalt.err (!%p866_p10)
}
  0x36   :  { %78 = dma.hbm_to_vmem [thread:$0]  %s1052_s6, 1024, %s73_s24, [#allocation9], %s899_s30, %s899_s30, %s900_s9  }
  0x37   :  { %890 = dma.done.wait [#allocation3], 128  }
  0x38   :  { %891 = vsyncadd [#allocation3], 4294967168 }
  0x39   :  { %892 = dma.done.wait [#allocation6], 1536  }
  0x3a   :  { %893 = vsyncadd [#allocation6], 4294965760 }
  0x3b   :  { %894 = dma.done.wait [#allocation9], 2048  }
  0x3c   :  { %895 = vsyncadd [#allocation9], 4294965248  ;;  %v905_v0 = vmov 0.0   ;;  %vm906_vm0 = vmmov 0   ;;  %v738_v1 = vld [vmem:[#allocation5 + $0x18] sm:$0xff]   ;;  %v739_v2 = vld [vmem:[#allocation5 + $0x10] sm:$0xff]   ;;  %v200_v37 = vlaneseq }
  0x3d   :  { %656 = vmatprep.subr.bf16.mxu0 %v905_v0  ;;  %664 = vmatprep.mubr.msk.bf16.mxu0 %vm906_vm0, %v905_v0  ;;  %v740_v3 = vld [vmem:[#allocation5 + $0x8] sm:$0xff]   ;;  %vm131_vm1 = vcmask 523264   ;;  %v741_v4 = vld [vmem:[#allocation5] sm:$0xff]   ;;  %v97_v5 = vld [vmem:[#allocation2] sm:$0xff]  ;;  %s907_s11 = smov [#allocation11]  }
  0x3e   :  { %668 = vmatprep.subr.bf16.mxu1 %v905_v0  ;;  %684 = vmatprep.mubr.msk.bf16.mxu1 %vm906_vm0, %v905_v0  ;;  %v98_v6 = vpack.c.bf16 %v97_v5, %v97_v5  ;;  %v742_v7 = vld [vmem:[#allocation7 + $0x38] sm:$0xff]   ;;  %v743_v8 = vld [vmem:[#allocation7 + $0x30] sm:$0xff]   ;;  %v744_v9 = vld [vmem:[#allocation7 + $0x28] sm:$0xff]   ;;  %v1000_v38 = vshrl.u32 %v200_v37, 7  ;;  %s583_s12 = sshll.u32 %s907_s11, 4  ;;  %s584_s12 = int_to_ptr.vmem [resolvable:$true] %s583_s12 }
  0x3f   :  { %657 = vmatpush3.bf16.msra.mxu0 %v738_v1  ;;  %669 = vmatpush3.bf16.msra.mxu1 %v742_v7  ;;  %v745_v10 = vld [vmem:[#allocation7 + $0x20] sm:$0xff]   ;;  %v746_v11 = vld [vmem:[#allocation7 + $0x18] sm:$0xff]   ;;  %v747_v12 = vld [vmem:[#allocation7 + $0x10] sm:$0xff]   ;;  %s870_s13 = scalar_lea.vmem %s584_s12, 128  ;;  %p875_p12 = scmp.lt.s32.totalorder %s584_s12, %s584_s12 }
  0x40   :  { %658 = vmatprep.subr.bf16.mxu0 %v905_v0  ;;  %670 = vmatprep.subr.bf16.mxu1 %v905_v0  ;;  %v748_v13 = vld [vmem:[#allocation7 + $0x8] sm:$0xff]   ;;  %v749_v14 = vld [vmem:[#allocation7] sm:$0xff]   ;;  %v175_v39 = vld [vmem:[%s1048_s2] sm:$0x1]  ;;  %v1006_v40 = vsub.s32 0, %v1000_v38  ;;  %p871_p11 = scmp.ne.s32.totalorder %s584_s12, %s870_s13  ;;  %p876_p13 = scmp.lt.s32.totalorder %s870_s13, %s870_s13 }
  0x41   :  { %v176_v43 = vld [vmem:[%s1048_s2 + $0x1] sm:$0x1]  ;;  %v751_v53 = vld [vmem:[#allocation8 + $0x30] sm:$0xff]   ;;  %v752_v54 = vld [vmem:[#allocation8 + $0x28] sm:$0xff]  }
  0x42   :  { %v750_v52 = vld [vmem:[#allocation8 + $0x38] sm:$0xff]   ;;  %v753_v55 = vld [vmem:[#allocation8 + $0x20] sm:$0xff]   ;;  %v755_v57 = vld [vmem:[#allocation8 + $0x10] sm:$0xff]   ;;  %p877_p0 = por %p876_p13, %p875_p12 }
  0x43   :  { %659 = vmatpush3.bf16.msra.mxu0 %v739_v2  ;;  %671 = vmatpush3.bf16.msra.mxu1 %v743_v8  ;;  %v754_v56 = vld [vmem:[#allocation8 + $0x18] sm:$0xff]   ;;  %v756_v58 = vld [vmem:[#allocation8 + $0x8] sm:$0xff]   ;;  %v757_v59 = vld [vmem:[#allocation8] sm:$0xff]  }
  0x44   :  { %660 = vmatprep.subr.bf16.mxu0 %v905_v0  ;;  %672 = vmatprep.subr.bf16.mxu1 %v905_v0  ;;  %v758_v60 = vld [vmem:[#allocation10 + $0x38] sm:$0xff]   ;;  %v759_v61 = vld [vmem:[#allocation10 + $0x30] sm:$0xff]   ;;  %v760_v62 = vld [vmem:[#allocation10 + $0x28] sm:$0xff]   ;;  %p878_p1 = pnand %p877_p0, %p871_p11 }
  0x45   :  { %v761_v63 = vld [vmem:[#allocation10 + $0x20] sm:$0xff]   ;;  %v762_v1 = vld [vmem:[#allocation10 + $0x18] sm:$0xff]   ;;  %v763_v2 = vld [vmem:[#allocation10 + $0x10] sm:$0xff]  }
  0x47   :  { %661 = vmatpush3.bf16.msra.mxu0 %v740_v3  ;;  %673 = vmatpush3.bf16.msra.mxu1 %v744_v9 }
  0x48   :  { %662 = vmatprep.subr.bf16.mxu0 %v905_v0  ;;  %674 = vmatprep.subr.bf16.mxu1 %v905_v0 }
  0x4b   :  { %663 = vmatpush3.bf16.msra.mxu0 %v741_v4  ;;  %675 = vmatpush3.bf16.msra.mxu1 %v745_v10 }
  0x4c   :  { %688 = vmatprep.subr.bf16.mxu0 %v905_v0  ;;  %676 = vmatprep.subr.bf16.mxu1 %v905_v0 }
  0x4e   :  { %665 = vmatmul.mubr.msk.bf16.vlgmr.msra.gmra.mxu0 %vm131_vm1, %v98_v6 }
  0x4f   :  { %704 = vmatprep.mubr.msk.bf16.mxu0 %vm906_vm0, %v905_v0  ;;  %677 = vmatpush3.bf16.msra.mxu1 %v746_v11 }
  0x50   :  { %678 = vmatprep.subr.bf16.mxu1 %v905_v0  ;;  %689 = vmatpush3.bf16.msra.mxu0 %v750_v52  ;;  %v615_v52 = vld [vmem:[%s1053_s7] ss:$0 sm:$0xff] }
  0x51   :  { %690 = vmatprep.subr.bf16.mxu0 %v905_v0 }
  0x53   :  { %679 = vmatpush3.bf16.msra.mxu1 %v747_v12 }
  0x54   :  { %680 = vmatprep.subr.bf16.mxu1 %v905_v0  ;;  %691 = vmatpush3.bf16.msra.mxu0 %v751_v53 }
  0x55   :  { %692 = vmatprep.subr.bf16.mxu0 %v905_v0 }
  0x57   :  { %681 = vmatpush3.bf16.msra.mxu1 %v748_v13 }
  0x58   :  { %682 = vmatprep.subr.bf16.mxu1 %v905_v0  ;;  %693 = vmatpush3.bf16.msra.mxu0 %v752_v54 }
  0x59   :  { %694 = vmatprep.subr.bf16.mxu0 %v905_v0 }
  0x5b   :  { %683 = vmatpush3.bf16.msra.mxu1 %v749_v14 }
  0x5c   :  { %708 = vmatprep.subr.bf16.mxu1 %v905_v0  ;;  %695 = vmatpush3.bf16.msra.mxu0 %v753_v55 }
  0x5d   :  { %696 = vmatprep.subr.bf16.mxu0 %v905_v0 }
  0x60   :  { %697 = vmatpush3.bf16.msra.mxu0 %v754_v56 }
  0x61   :  { %698 = vmatprep.subr.bf16.mxu0 %v905_v0 }
  0x64   :  { %699 = vmatpush3.bf16.msra.mxu0 %v755_v57 }
  0x65   :  { %700 = vmatprep.subr.bf16.mxu0 %v905_v0 }
  0x68   :  { %701 = vmatpush3.bf16.msra.mxu0 %v756_v58 }
  0x69   :  { %702 = vmatprep.subr.bf16.mxu0 %v905_v0 }
  0x6c   :  { %703 = vmatpush3.bf16.msra.mxu0 %v757_v59 }
 0x10e   :  { %v169_v15 = vpop.f32.mrf.mxu0 }
 0x10f   :  { %v177_v16 = vrot.slane %v169_v15, 4  ;;  %v185_v17 = vmul.f32 %v169_v15, %v169_v15 }
 0x110   :  { %v666_v18 = vpop.f32.mrf.mxu0 }
 0x111   :  { %v178_v19 = vadd.f32 %v177_v16, %v169_v15  ;;  %v186_v20 = vrot.slane %v185_v17, 4 }
 0x112   :  { %v172_v21 = vpop.f32.mrf.mxu0 }
 0x113   :  { %v179_v22 = vrot.slane %v178_v19, 2  ;;  %v187_v23 = vadd.f32 %v186_v20, %v185_v17 }
 0x114   :  { %v667_v24 = vpop.f32.mrf.mxu0 }
 0x115   :  { %v180_v25 = vadd.f32 %v179_v22, %v178_v19  ;;  %v188_v26 = vrot.slane %v187_v23, 2 }
 0x117   :  { %v181_v27 = vrot.slane %v180_v25, 1  ;;  %v189_v28 = vadd.f32 %v188_v26, %v187_v23 }
 0x119   :  { %v182_v29 = vadd.f32 %v181_v27, %v180_v25  ;;  %v190_v30 = vrot.slane %v189_v28, 1  ;;  %v211_v25 = vld [vmem:[%s1051_s5] sm:$0x7] }
 0x11b   :  { %v184_v31 = vmul.f32 0.125, %v182_v29  ;;  %v191_v32 = vadd.f32 %v190_v30, %v189_v28 }
 0x11d   :  { %v192_v33 = vmul.f32 0.125, %v191_v32  ;;  %v193_v34 = vmul.f32 %v184_v31, %v184_v31 }
 0x11f   :  { %v194_v35 = vsub.f32 %v192_v33, %v193_v34 }
 0x121   :  { %v195_v36 = vadd.f32 1e-05, %v194_v35 }
 0x123   :  { %766 = vrsqrt.f32 %v195_v36 }
 0x130   :  { %v767_v41 = vpop.eup %766 }
 0x131   :  { %v197_v42 = vmul.f32 %v767_v41, %v175_v39  ;;  %v764_v39 = vld [vmem:[#allocation10 + $0x8] sm:$0xff]   ;;  %v765_v41 = vld [vmem:[#allocation10] sm:$0xff]  }
 0x133   :  { %v198_v44 = vmul.f32 %v197_v42, %v184_v31  ;;  %v203_v45 = vrot.slane %v197_v42, %v1006_v40  ;;  %v349_v31 = vsub.s32 1, %v1000_v38  ;;  %v372_v42 = vsub.s32 2, %v1000_v38 }
 0x135   :  { %v199_v46 = vsub.f32 %v176_v43, %v198_v44  ;;  %v204_v47 = vmul.f32 %v203_v45, %v169_v15  ;;  %v373_v43 = vrot.slane %v211_v25, %v372_v42 }
 0x137   :  { %v208_v48 = vrot.slane %v199_v46, %v1006_v40 }
 0x139   :  { %v209_v49 = vadd.f32 %v208_v48, %v204_v47 }
 0x13b   :  { %v1013_v50 = vmax.f32 %v209_v49, 0.0 }
 0x13d   :  { %v212_v51 = vpack.c.bf16 %v1013_v50, %v1013_v50 }
 0x13f   :  { %685 = vmatmul.mubr.bf16.vlgmr.msra.gmra.mxu1 %v212_v51 }
 0x140   :  { %724 = vmatprep.mubr.msk.bf16.mxu1 %vm906_vm0, %v905_v0  ;;  %709 = vmatpush3.bf16.msra.mxu1 %v758_v60 }
 0x141   :  { %710 = vmatprep.subr.bf16.mxu1 %v905_v0 }
 0x144   :  { %711 = vmatpush3.bf16.msra.mxu1 %v759_v61 }
 0x145   :  { %712 = vmatprep.subr.bf16.mxu1 %v905_v0 }
 0x148   :  { %713 = vmatpush3.bf16.msra.mxu1 %v760_v62 }
 0x149   :  { %714 = vmatprep.subr.bf16.mxu1 %v905_v0 }
 0x14c   :  { %715 = vmatpush3.bf16.msra.mxu1 %v761_v63 }
 0x14d   :  { %716 = vmatprep.subr.bf16.mxu1 %v905_v0 }
 0x150   :  { %717 = vmatpush3.bf16.msra.mxu1 %v762_v1 }
 0x151   :  { %718 = vmatprep.subr.bf16.mxu1 %v905_v0 }
 0x154   :  { %719 = vmatpush3.bf16.msra.mxu1 %v763_v2 }
 0x155   :  { %720 = vmatprep.subr.bf16.mxu1 %v905_v0 }
 0x158   :  { %721 = vmatpush3.bf16.msra.mxu1 %v764_v39 }
 0x159   :  { %722 = vmatprep.subr.bf16.mxu1 %v905_v0 }
 0x15c   :  { %723 = vmatpush3.bf16.msra.mxu1 %v765_v41 }
 0x1ff   :  { %v311_v3 = vpop.f32.mrf.mxu1 }
 0x200   :  { %v317_v4 = vrot.slane %v311_v3, 4  ;;  %v324_v5 = vmul.f32 %v311_v3, %v311_v3 }
 0x201   :  { %v686_v6 = vpop.f32.mrf.mxu1 }
 0x202   :  { %v318_v7 = vadd.f32 %v317_v4, %v311_v3  ;;  %v325_v8 = vrot.slane %v324_v5, 4 }
 0x203   :  { %v314_v9 = vpop.f32.mrf.mxu1 }
 0x204   :  { %v319_v10 = vrot.slane %v318_v7, 2  ;;  %v326_v11 = vadd.f32 %v325_v8, %v324_v5 }
 0x205   :  { %v687_v12 = vpop.f32.mrf.mxu1 }
 0x206   :  { %v320_v13 = vadd.f32 %v319_v10, %v318_v7  ;;  %v327_v14 = vrot.slane %v326_v11, 2 }
 0x208   :  { %v321_v15 = vrot.slane %v320_v13, 1  ;;  %v328_v16 = vadd.f32 %v327_v14, %v326_v11 }
 0x20a   :  { %v322_v17 = vadd.f32 %v321_v15, %v320_v13  ;;  %v329_v18 = vrot.slane %v328_v16, 1 }
 0x20c   :  { %v323_v19 = vmul.f32 0.125, %v322_v17  ;;  %v330_v20 = vadd.f32 %v329_v18, %v328_v16 }
 0x20e   :  { %v331_v21 = vmul.f32 0.125, %v330_v20  ;;  %v332_v22 = vmul.f32 %v323_v19, %v323_v19 }
 0x210   :  { %v333_v23 = vsub.f32 %v331_v21, %v332_v22 }
 0x212   :  { %v334_v24 = vadd.f32 1e-05, %v333_v23 }
 0x214   :  { %768 = vrsqrt.f32 %v334_v24 }
 0x221   :  { %v769_v26 = vpop.eup %768 }
 0x222   :  { %v336_v27 = vmul.f32 %v769_v26, %v211_v25 }
 0x224   :  { %v337_v28 = vmul.f32 %v336_v27, %v323_v19  ;;  %v345_v30 = vrot.slane %v336_v27, %v1006_v40 }
 0x226   :  { %v339_v29 = vrot.slane %v337_v28, 7  ;;  %v346_v33 = vmul.f32 %v345_v30, %v311_v3 }
 0x228   :  { %v341_v32 = vsub.f32 %v211_v25, %v339_v29 }
 0x22a   :  { %v350_v34 = vrot.slane %v341_v32, %v349_v31 }
 0x22c   :  { %v351_v35 = vadd.f32 %v350_v34, %v346_v33 }
 0x22e   :  { %v352_v36 = vmax.f32 %v351_v35, 0.0 }
 0x230   :  { %v353_v37 = vpack.c.bf16 %v352_v36, %v352_v36 }
 0x232   :  { %705 = vmatmul.mubr.bf16.vlgmr.msra.gmra.mxu0 %v353_v37 }
 0x2f2   :  { %v456_v44 = vpop.f32.mrf.mxu0 }
 0x2f3   :  { %v457_v40 = vadd.f32 %v456_v44, %v373_v43 }
 0x2f4   :  { %v706_v45 = vpop.f32.mrf.mxu0 }
 0x2f5   :  { %v462_v46 = vadd.f32 %v457_v40, %v1013_v50 }
 0x2f6   :  { %v459_v47 = vpop.f32.mrf.mxu0 }
 0x2f7   :  { %v463_v48 = vmax.f32 %v462_v46, 0.0 }
 0x2f8   :  { %v707_v49 = vpop.f32.mrf.mxu0 }
 0x2f9   :  { %v464_v51 = vpack.c.bf16 %v463_v48, %v463_v48 }
 0x2fb   :  { %725 = vmatmul.mubr.bf16.vlgmr.msra.gmra.mxu1 %v464_v51 }
 0x3bb   :  { %v570_v0 = vpop.f32.mrf.mxu1 }
 0x3bc   :  { %v571_v53 = vadd.f32 %v615_v52, %v570_v0 }
 0x3bd   :  { %v726_v38 = vpop.f32.mrf.mxu1 }
 0x3be   :  { %576 = vst [vmem:[#allocation11] sm:$0xff] %v571_v53 }
 0x3bf   :  { %v573_v54 = vpop.f32.mrf.mxu1 }
 0x3c0   :  { %881 = shalt.err (!%p878_p1)
}
 0x3c1   :  { %586 = dma.vmem_to_hbm [thread:$0]  %s584_s12, 128, %s1054_s8, [#allocation4]   ;;  %v727_v50 = vpop.f32.mrf.mxu1 }
 0x3c2   :  { %896 = dma.done.wait [#allocation4], 128  }
 0x3c3   :  { %897 = vsyncadd [#allocation4], 4294967168 }
 0x3c4   :  { %590 = vsyncpa [#allocation3], 1 }
 0x3c5   :  { %591 = vsyncpa [#allocation6], 1 }
 0x3c6   :  { %592 = vsyncpa [#allocation9], 1 }
 0x3c7   :  { %593 = vsyncpa [#allocation4], 1 }

</bundles_post_ra>
